<compile_context>
chip_gen: v6e
topology: v6e:2x2x1
jax: 0.10.0
libtpu: 0.0.40
codegen_flags: <defaults>
</compile_context>

<pallas_src>
import functools

import jax
import jax.numpy as jnp
from jax.experimental import pallas as pl
from jax.experimental.pallas import tpu as pltpu


def _round_up(x, m):
    return (x + m - 1) // m * m


def _dice_partial_kernel(probs_ref, mask_ref, inter_ref, den_ref, *,
                         l_total, l_chunk, need_mask):
    # probs_ref / mask_ref : (TB, LC) block of the (N, L) slab.
    # inter_ref / den_ref  : (1, 1, TB, 1) partial-sum blocks.
    p = probs_ref[...].astype(jnp.float32)
    m = mask_ref[...].astype(jnp.float32)

    pm = p * m
    dd = p * p + m * m          # fused den1 + den2

    if need_mask:
        # Zero the L tail of the last spatial chunk (boundary-block reads
        # are unspecified, and they share rows with valid data).
        lj = pl.program_id(1)
        col = jax.lax.broadcasted_iota(jnp.int32, p.shape, 1) + lj * l_chunk
        keep = col < l_total
        pm = jnp.where(keep, pm, 0.0)
        dd = jnp.where(keep, dd, 0.0)

    inter = jnp.sum(pm, axis=-1, keepdims=True)   # (TB, 1)
    den = jnp.sum(dd, axis=-1, keepdims=True)     # (TB, 1)

    inter_ref[...] = inter[None, None]
    den_ref[...] = den[None, None]


@jax.jit
def dice_loss(output, mask):
    """output, mask: (N, 1, H, W) arrays. Returns scalar loss (float32)."""
    probs = jnp.squeeze(output, axis=1)   # (N, H, W)
    msk = jnp.squeeze(mask, axis=1)       # (N, H, W)
    n, h, w = probs.shape
    l = h * w

    # Lane-dense flatten (metadata-only reshape, no HBM pass, no padding).
    probs2 = probs.reshape(n, l)
    msk2 = msk.reshape(n, l)

    itemsize = jnp.dtype(probs2.dtype).itemsize

    # ---- generation-aware VMEM budget ---------------------------------
    try:
        vmem_cap = pltpu.get_tpu_info().vmem_capacity_bytes
    except Exception:  # interpret mode / unknown target
        vmem_cap = 64 * 1024 * 1024
    if vmem_cap <= 64 * 1024 * 1024:      # v7x: 64 MiB VMEM per TensorCore
        total_budget = 48 * 1024 * 1024
    else:                                  # v5e / v6e: 128 MiB
        total_budget = 80 * 1024 * 1024
    per_input_target = min(8 * 1024 * 1024, total_budget // 4)
    target_elems = max(1024, per_input_target // itemsize)

    # ---- tile selection ------------------------------------------------
    # L chunk: multiple of 128, bounded so VMEM use is independent of H*W.
    lc_cap = max(128, (target_elems // 8) // 128 * 128)
    l_chunk = min(_round_up(l, 128), lc_cap)
    l_blocks = pl.cdiv(l, l_chunk)

    # Batch tile: multiple of 8, fills the remaining per-block budget.
    tb_cap = max(8, (target_elems // l_chunk) // 8 * 8)
    tb = min(_round_up(n, 8), tb_cap)
    n_blocks = pl.cdiv(n, tb)

    # Guarantee >= 2 grid steps so the "parallel" axes can actually be split
    # across both v7x TensorCores (and keep the DMA pipeline busy).
    if n_blocks * l_blocks < 2:
        if n >= 16:
            tb = max(8, _round_up(pl.cdiv(n, 2), 8))
            n_blocks = pl.cdiv(n, tb)
        elif l > 128:
            l_chunk = max(128, _round_up(pl.cdiv(l, 2), 128))
            l_blocks = pl.cdiv(l, l_chunk)

    need_mask = (l % l_chunk) != 0

    kernel = functools.partial(
        _dice_partial_kernel, l_total=l, l_chunk=l_chunk, need_mask=need_mask)

    out_part = jax.ShapeDtypeStruct((l_blocks, n_blocks, tb, 1), jnp.float32)

    inter_p, den_p = pl.pallas_call(
        kernel,
        out_shape=(out_part, out_part),
        grid_spec=pltpu.PrefetchScalarGridSpec(
            num_scalar_prefetch=0,
            grid=(n_blocks, l_blocks),
            in_specs=[
                pl.BlockSpec((tb, l_chunk), lambda bi, lj: (bi, lj)),
                pl.BlockSpec((tb, l_chunk), lambda bi, lj: (bi, lj)),
            ],
            out_specs=[
                pl.BlockSpec((1, 1, tb, 1), lambda bi, lj: (lj, bi, 0, 0)),
                pl.BlockSpec((1, 1, tb, 1), lambda bi, lj: (lj, bi, 0, 0)),
            ],
        ),
        compiler_params=pltpu.CompilerParams(
            dimension_semantics=("parallel", "parallel"),
            vmem_limit_bytes=total_budget,
        ),
    )(probs2, msk2)

    # Tiny epilogue: reduce partial sums over L blocks, drop out-of-range
    # batch rows, compute dice and the mean.
    inter = jnp.sum(inter_p, axis=0).reshape(n_blocks * tb)[:n]
    den = jnp.sum(den_p, axis=0).reshape(n_blocks * tb)[:n]
    eps = jnp.float32(1e-08)
    dice = 2.0 * ((inter + eps) / (den + eps))
    return jnp.float32(1.0) - jnp.sum(dice) / jnp.float32(n)


def _dice_loss_ref(output, mask):
    probs = jnp.squeeze(output, axis=1).astype(jnp.float32)
    m = jnp.squeeze(mask, axis=1).astype(jnp.float32)
    inter = jnp.sum(probs * m, axis=(1, 2))
    den1 = jnp.sum(probs * probs, axis=(1, 2))
    den2 = jnp.sum(m * m, axis=(1, 2))
    eps = 1e-08
    dice = 2.0 * ((inter + eps) / (den1 + den2 + eps))
    return 1.0 - jnp.sum(dice) / dice.shape[0]


if __name__ == "__main__":
    key = jax.random.PRNGKey(0)
    k1, k2 = jax.random.split(key)

    N, C, H, W = 2, 1, 16, 16
    # "output" acts like predicted probabilities, "mask" like a binary target.
    output = jax.nn.sigmoid(jax.random.normal(k1, (N, C, H, W), dtype=jnp.float32))
    mask = (jax.random.uniform(k2, (N, C, H, W), dtype=jnp.float32) > 0.5).astype(
        jnp.float32
    )

    loss = dice_loss(output, mask)
    jax.block_until_ready(loss)

    ref = _dice_loss_ref(output, mask)
    assert jnp.allclose(loss, ref, rtol=1e-5, atol=1e-6), (loss, ref)

    print("KERNEL_OK")
</pallas_src>

<mosaic_0001>
module attributes {stable_mosaic.version = 11 : i64} {
  func.func @_dice_partial_kernel(%arg0: i32, %arg1: i32, %arg2: memref<8x128xf32, #tpu.memory_space<vmem>>, %arg3: memref<8x128xf32, #tpu.memory_space<vmem>>, %arg4: memref<1x1x8x1xf32, #tpu.memory_space<vmem>>, %arg5: memref<1x1x8x1xf32, #tpu.memory_space<vmem>>) attributes {dimension_semantics = [#tpu.dimension_semantics<parallel>, #tpu.dimension_semantics<parallel>], iteration_bounds = array<i64: 1, 2>, scalar_prefetch = 0 : i64, scratch_operands = 0 : i64, tpu.core_type = #tpu.core_type<tc>, window_params = [{transform_indices = @transform_0, window_bounds = array<i64: 8, 128>}, {transform_indices = @transform_1, window_bounds = array<i64: 8, 128>}, {transform_indices = @transform_2, window_bounds = array<i64: 1, 1, 8, 1>}, {transform_indices = @transform_3, window_bounds = array<i64: 1, 1, 8, 1>}]} {
    %c0 = arith.constant 0 : index
    %c0_0 = arith.constant 0 : index
    %0 = vector.load %arg2[%c0, %c0_0] : memref<8x128xf32, #tpu.memory_space<vmem>>, vector<8x128xf32>
    %c0_1 = arith.constant 0 : index
    %c0_2 = arith.constant 0 : index
    %1 = vector.load %arg3[%c0_1, %c0_2] : memref<8x128xf32, #tpu.memory_space<vmem>>, vector<8x128xf32>
    %2 = arith.mulf %0, %1 : vector<8x128xf32>
    %3 = arith.mulf %0, %0 : vector<8x128xf32>
    %4 = arith.mulf %1, %1 : vector<8x128xf32>
    %5 = arith.addf %3, %4 : vector<8x128xf32>
    %cst = arith.constant dense<0.000000e+00> : vector<8xf32>
    %6 = vector.multi_reduction <add>, %2, %cst [1] : vector<8x128xf32> to vector<8xf32>
    %7 = vector.shape_cast %6 : vector<8xf32> to vector<8x1xf32>
    %cst_3 = arith.constant dense<0.000000e+00> : vector<8xf32>
    %8 = vector.multi_reduction <add>, %5, %cst_3 [1] : vector<8x128xf32> to vector<8xf32>
    %9 = vector.shape_cast %8 : vector<8xf32> to vector<8x1xf32>
    %10 = vector.shape_cast %7 : vector<8x1xf32> to vector<1x1x8x1xf32>
    %c0_4 = arith.constant 0 : index
    %c0_5 = arith.constant 0 : index
    %c0_6 = arith.constant 0 : index
    %c0_7 = arith.constant 0 : index
    %11 = vector.load %arg4[%c0_4, %c0_5, %c0_6, %c0_7] : memref<1x1x8x1xf32, #tpu.memory_space<vmem>>, vector<1x1x8x1xf32>
    tpu.vector_store %arg4[%c0_4, %c0_5, %c0_6, %c0_7], %10 {strides = array<i32>} : memref<1x1x8x1xf32, #tpu.memory_space<vmem>>, vector<1x1x8x1xf32>,
    %12 = vector.shape_cast %9 : vector<8x1xf32> to vector<1x1x8x1xf32>
    %c0_8 = arith.constant 0 : index
    %c0_9 = arith.constant 0 : index
    %c0_10 = arith.constant 0 : index
    %c0_11 = arith.constant 0 : index
    %13 = vector.load %arg5[%c0_8, %c0_9, %c0_10, %c0_11] : memref<1x1x8x1xf32, #tpu.memory_space<vmem>>, vector<1x1x8x1xf32>
    tpu.vector_store %arg5[%c0_8, %c0_9, %c0_10, %c0_11], %12 {strides = array<i32>} : memref<1x1x8x1xf32, #tpu.memory_space<vmem>>, vector<1x1x8x1xf32>,
    return
  }
  func.func @transform_0(%arg0: i32, %arg1: i32) -> (i32, i32) {
    %c0_i32 = arith.constant 0 : i32
    return %arg0, %arg1 : i32, i32
  }
  func.func @transform_1(%arg0: i32, %arg1: i32) -> (i32, i32) {
    %c0_i32 = arith.constant 0 : i32
    return %arg0, %arg1 : i32, i32
  }
  func.func @transform_2(%arg0: i32, %arg1: i32) -> (i32, i32, i32, i32) {
    %c0_i32 = arith.constant 0 : i32
    %c0_i32_0 = arith.constant 0 : i32
    %c0_i32_1 = arith.constant 0 : i32
    return %arg1, %arg0, %c0_i32, %c0_i32_0 : i32, i32, i32, i32
  }
  func.func @transform_3(%arg0: i32, %arg1: i32) -> (i32, i32, i32, i32) {
    %c0_i32 = arith.constant 0 : i32
    %c0_i32_0 = arith.constant 0 : i32
    %c0_i32_1 = arith.constant 0 : i32
    return %arg1, %arg0, %c0_i32, %c0_i32_0 : i32, i32, i32, i32
  }
}

</mosaic_0001>

<bundles_post_ra>
// kernel: squeeze.3
= control target key start
LH: loop header
LB: loop body
LE: loop exit
PB: predicated region body
PF: predicated region fallthrough
CT: control target
= control target key end

     0   :  { %s8_s6 = smov 3  ;;  %s11_s7 = smov 12  ;;  %vm13_vm0 = vcmask 1043458   ;;  %vm3_vm1 = vcmask 130048   ;;  %vm17_vm2 = vcmask 1048448   ;;  %vm31_vm3 = vcmask 917248   ;;  %s216_s0 = inlined_call_operand.vmem [shape: f32[2,1,16,16], index: 0, kind: input, shape index: {}]   ;;  %s217_s1 = inlined_call_operand.vmem [shape: f32[2,256], index: 1, kind: output, shape index: {}]  }
   0x1   :  { %v119_v0 = vld [vmem:[%s216_s0 + $0x7] ss:$16 sm:%s8_s6]   ;;  %v120_v1 = vld [vmem:[%s216_s0 - $0x11] ss:$16 sm:%s11_s7]   ;;  %s36_s12 = smov 3  ;;  %s39_s15 = smov 12 }
   0x2   :  { %v14_v2 = vsel %vm13_vm0, %v120_v1, %v119_v0  ;;  %v123_v3 = vld [vmem:[%s216_s0 + $0x5] ss:$16 sm:%s36_s12]   ;;  %s141_s16 = smov 112   ;;  %v124_v4 = vld [vmem:[%s216_s0 - $0x13] ss:$16 sm:%s39_s15]   ;;  %s22_s19 = smov 3 }
   0x3   :  { %15 = vrot.lane.b32.xlu0 %v14_v2, %s141_s16  ;;  %s25_s20 = smov 12  ;;  %v42_v5 = vsel %vm13_vm0, %v124_v4, %v123_v3  ;;  %v121_v6 = vld [vmem:[%s216_s0 + $0x6] ss:$16 sm:%s22_s19]   ;;  %s50_s25 = smov 3  ;;  %vm45_vm4 = vcmask 786048   ;;  %vm59_vm5 = vcmask 654848  }
   0x4   :  { %v122_v7 = vld [vmem:[%s216_s0 - $0x12] ss:$16 sm:%s25_s20]   ;;  %s142_s26 = smov 80   ;;  %v125_v9 = vld [vmem:[%s216_s0 + $0x4] ss:$16 sm:%s50_s25]   ;;  %s53_s29 = smov 12 }
   0x5   :  { %43 = vrot.lane.b32.xlu1 %v42_v5, %s142_s26  ;;  %v28_v8 = vsel %vm13_vm0, %v122_v7, %v121_v6  ;;  %v126_v10 = vld [vmem:[%s216_s0 - $0x14] ss:$16 sm:%s53_s29]   ;;  %s64_s3 = smov 3  ;;  %s67_s4 = smov 12  ;;  %vm73_vm6 = vcmask 523648   ;;  %vm87_vm7 = vcmask 392448  }
   0x6   :  { %s143_s5 = smov 96   ;;  %v56_v11 = vsel %vm13_vm0, %v126_v10, %v125_v9  ;;  %v127_v12 = vld [vmem:[%s216_s0 + $0x3] ss:$16 sm:%s64_s3]   ;;  %s78_s8 = smov 3  ;;  %v128_v13 = vld [vmem:[%s216_s0 - $0x15] ss:$16 sm:%s67_s4]  }
   0x7   :  { %29 = vrot.lane.b32.xlu0 %v28_v8, %s143_s5  ;;  %v129_v14 = vld [vmem:[%s216_s0 + $0x2] ss:$16 sm:%s78_s8]   ;;  %s81_s13 = smov 12  ;;  %s144_s14 = smov 64   ;;  %v70_v15 = vsel %vm13_vm0, %v128_v13, %v127_v12  ;;  %vm101_vm8 = vcmask 261248  }
   0x8   :  { %v130_v16 = vld [vmem:[%s216_s0 - $0x16] ss:$16 sm:%s81_s13]   ;;  %s92_s17 = smov 3  ;;  %s95_s18 = smov 12 }
   0x9   :  { %57 = vrot.lane.b32.xlu1 %v56_v11, %s144_s14  ;;  %v84_v17 = vsel %vm13_vm0, %v130_v16, %v129_v14  ;;  %v131_v18 = vld [vmem:[%s216_s0 + $0x1] ss:$16 sm:%s92_s17]   ;;  %s145_s23 = smov 48   ;;  %v2_v20 = vld [vmem:[%s216_s0] ss:$8 sm:$0xf]  }
   0xa   :  { %v132_v19 = vld [vmem:[%s216_s0 - $0x17] ss:$16 sm:%s95_s18]   ;;  %4 = vst.msk [vmem:[#allocation0] ss:$8 sm:$0x3] %vm3_vm1, %v2_v20   ;;  %s146_s0 = smov 32  }
   0xb   :  { %71 = vrot.lane.b32.xlu0 %v70_v15, %s145_s23  ;;  %v98_v21 = vsel %vm13_vm0, %v132_v19, %v131_v18  ;;  %6 = vst.msk [vmem:[#allocation0 - $0xf] ss:$8 sm:$0xc] %vm3_vm1, %v2_v20   ;;  %s147_s26 = smov 16  }
   0xd   :  { %85 = vrot.lane.b32.xlu1 %v84_v17, %s146_s0 }
   0xf   :  { %99 = vrot.lane.b32.xlu0 %v98_v21, %s147_s26 }
  0x75   :  { %v16_v22 = vpop.permute.xlu0 %15  }
  0x76   :  { %18 = vst.msk [vmem:[#allocation0] sm:$0x3] %vm17_vm2, %v16_v22   ;;  %20 = vst.msk [vmem:[#allocation0 + $0x6] sm:$0xc] %vm17_vm2, %v16_v22  }
  0x77   :  { %v44_v23 = vpop.permute.xlu1 %43  }
  0x79   :  { %v30_v24 = vpop.permute.xlu0 %29  }
  0x7a   :  { %32 = vst.msk [vmem:[#allocation0] sm:$0x3] %vm31_vm3, %v30_v24   ;;  %34 = vst.msk [vmem:[#allocation0 + $0x6] sm:$0xc] %vm31_vm3, %v30_v24  }
  0x7b   :  { %46 = vst.msk [vmem:[#allocation0] sm:$0x3] %vm45_vm4, %v44_v23   ;;  %48 = vst.msk [vmem:[#allocation0 + $0x6] sm:$0xc] %vm45_vm4, %v44_v23   ;;  %v58_v25 = vpop.permute.xlu1 %57  }
  0x7c   :  { %60 = vst.msk [vmem:[#allocation0] sm:$0x3] %vm59_vm5, %v58_v25   ;;  %62 = vst.msk [vmem:[#allocation0 + $0x6] sm:$0xc] %vm59_vm5, %v58_v25  }
  0x7d   :  { %v72_v26 = vpop.permute.xlu0 %71  }
  0x7e   :  { %74 = vst.msk [vmem:[#allocation0] sm:$0x3] %vm73_vm6, %v72_v26   ;;  %76 = vst.msk [vmem:[#allocation0 + $0x6] sm:$0xc] %vm73_vm6, %v72_v26  }
  0x7f   :  { %v86_v27 = vpop.permute.xlu1 %85  }
  0x80   :  { %88 = vst.msk [vmem:[#allocation0] sm:$0x3] %vm87_vm7, %v86_v27   ;;  %90 = vst.msk [vmem:[#allocation0 + $0x6] sm:$0xc] %vm87_vm7, %v86_v27  }
  0x81   :  { %v100_v28 = vpop.permute.xlu0 %99  }
  0x82   :  { %102 = vst.msk [vmem:[#allocation0] sm:$0x3] %vm101_vm8, %v100_v28   ;;  %104 = vst.msk [vmem:[#allocation0 + $0x6] sm:$0xc] %vm101_vm8, %v100_v28  }
  0x89   :  { %v109_v29 = vld [vmem:[#allocation0] sm:$0x3]  ;;  %v114_v30 = vld [vmem:[#allocation0 + $0x8] sm:$0x3] }
  0x8a   :  { %112 = vst [vmem:[%s217_s1] sm:$0x3] %v109_v29  ;;  %133 = vst [vmem:[%s217_s1 + $0x2] sm:$0x3] %v114_v30 }

// kernel: squeeze.2
= control target key start
LH: loop header
LB: loop body
LE: loop exit
PB: predicated region body
PF: predicated region fallthrough
CT: control target
= control target key end

     0   :  { %2 = vsyncpa [#allocation1], 0  ;;  %s161_s6 = smov [#allocation0]   ;;  %s197_s0 = inlined_call_operand.hbm [shape: f32[2,1,16,16], index: 0, kind: input, shape index: {}]   ;;  %s198_s1 = inlined_call_operand.vmem [shape: f32[2,256], index: 1, kind: output, shape index: {}]  }
   0x1   :  { %s7_s7 = sshll.u32 %s161_s6, 4  ;;  %s8_s7 = int_to_ptr.vmem [resolvable:$true] %s7_s7 }
   0x2   :  { %s147_s8 = scalar_lea.vmem %s8_s7, 512  ;;  %p152_p1 = scmp.lt.s32.totalorder %s8_s7, %s8_s7 }
   0x3   :  { %p148_p0 = scmp.ne.s32.totalorder %s8_s7, %s147_s8  ;;  %p153_p2 = scmp.lt.s32.totalorder %s147_s8, %s147_s8 }
   0x5   :  { %p154_p3 = por %p153_p2, %p152_p1 }
   0x7   :  { %p155_p4 = pnand %p154_p3, %p148_p0 }
   0x9   :  { %158 = shalt.err (!%p155_p4)
}
   0xa   :  { %10 = dma.hbm_to_vmem [thread:$0]  %s197_s0, 512, %s8_s7, [#allocation1]  }
   0xb   :  { %159 = dma.done.wait [#allocation1], 512  }
   0xc   :  { %160 = vsyncadd [#allocation1], 4294966784  ;;  %s18_s0 = smov 3  ;;  %s21_s11 = smov 12  ;;  %vm23_vm0 = vcmask 1043458   ;;  %vm13_vm1 = vcmask 130048  }
   0xd   :  { %s46_s12 = smov 3  ;;  %s49_s13 = smov 12  ;;  %v19_v0 = vld [vmem:[#allocation0 + $0x7] ss:$16 sm:%s18_s0]   ;;  %v22_v1 = vld [vmem:[#allocation0 - $0x11] ss:$16 sm:%s21_s11]  }
   0xe   :  { %s32_s14 = smov 3  ;;  %s35_s15 = smov 12  ;;  %v47_v2 = vld [vmem:[#allocation0 + $0x5] ss:$16 sm:%s46_s12]   ;;  %v24_v3 = vsel %vm23_vm0, %v22_v1, %v19_v0  ;;  %v50_v4 = vld [vmem:[#allocation0 - $0x13] ss:$16 sm:%s49_s13]  }
   0xf   :  { %s60_s16 = smov 3  ;;  %s63_s17 = smov 12  ;;  %v33_v5 = vld [vmem:[#allocation0 + $0x6] ss:$16 sm:%s32_s14]   ;;  %v36_v6 = vld [vmem:[#allocation0 - $0x12] ss:$16 sm:%s35_s15]   ;;  %v52_v7 = vsel %vm23_vm0, %v50_v4, %v47_v2 }
  0x10   :  { %s74_s18 = smov 3  ;;  %s77_s19 = smov 12  ;;  %v61_v8 = vld [vmem:[#allocation0 + $0x4] ss:$16 sm:%s60_s16]   ;;  %v64_v9 = vld [vmem:[#allocation0 - $0x14] ss:$16 sm:%s63_s17]   ;;  %v38_v10 = vsel %vm23_vm0, %v36_v6, %v33_v5 }
  0x11   :  { %s162_s20 = smov 112   ;;  %s163_s21 = smov 80   ;;  %v66_v11 = vsel %vm23_vm0, %v64_v9, %v61_v8  ;;  %v75_v12 = vld [vmem:[#allocation0 + $0x3] ss:$16 sm:%s74_s18]   ;;  %v78_v13 = vld [vmem:[#allocation0 - $0x15] ss:$16 sm:%s77_s19]  }
  0x12   :  { %25 = vrot.lane.b32.xlu0 %v24_v3, %s162_s20  ;;  %53 = vrot.lane.b32.xlu1 %v52_v7, %s163_s21  ;;  %s88_s22 = smov 3  ;;  %s91_s23 = smov 12  ;;  %v80_v16 = vsel %vm23_vm0, %v78_v13, %v75_v12  ;;  %v12_v17 = vld [vmem:[#allocation0] ss:$8 sm:$0xf]   ;;  %vm27_vm2 = vcmask 1048448  }
  0x13   :  { %v89_v14 = vld [vmem:[#allocation0 + $0x2] ss:$16 sm:%s88_s22]   ;;  %v92_v15 = vld [vmem:[#allocation0 - $0x16] ss:$16 sm:%s91_s23]   ;;  %s102_s24 = smov 3  ;;  %s105_s25 = smov 12 }
  0x14   :  { %s164_s26 = smov 96   ;;  %s165_s27 = smov 64   ;;  %v94_v18 = vsel %vm23_vm0, %v92_v15, %v89_v14  ;;  %v103_v19 = vld [vmem:[#allocation0 + $0x1] ss:$16 sm:%s102_s24]   ;;  %v106_v20 = vld [vmem:[#allocation0 - $0x17] ss:$16 sm:%s105_s25]  }
  0x15   :  { %14 = vst.msk [vmem:[#allocation2] ss:$8 sm:$0x3] %vm13_vm1, %v12_v17   ;;  %16 = vst.msk [vmem:[#allocation2 - $0xf] ss:$8 sm:$0xc] %vm13_vm1, %v12_v17   ;;  %v108_v21 = vsel %vm23_vm0, %v106_v20, %v103_v19 }
  0x16   :  { %39 = vrot.lane.b32.xlu0 %v38_v10, %s164_s26  ;;  %67 = vrot.lane.b32.xlu1 %v66_v11, %s165_s27  ;;  %s166_s28 = smov 48   ;;  %s167_s29 = smov 32   ;;  %vm41_vm3 = vcmask 917248   ;;  %vm55_vm4 = vcmask 786048   ;;  %vm69_vm5 = vcmask 654848   ;;  %vm83_vm6 = vcmask 523648  }
  0x17   :  { %s168_s30 = smov 16   ;;  %vm97_vm7 = vcmask 392448   ;;  %vm111_vm8 = vcmask 261248  }
  0x1a   :  { %81 = vrot.lane.b32.xlu0 %v80_v16, %s166_s28  ;;  %95 = vrot.lane.b32.xlu1 %v94_v18, %s167_s29 }
  0x1e   :  { %109 = vrot.lane.b32.xlu0 %v108_v21, %s168_s30 }
  0x84   :  { %v26_v22 = vpop.permute.xlu0 %25   ;;  %v54_v23 = vpop.permute.xlu1 %53  }
  0x85   :  { %28 = vst.msk [vmem:[#allocation2] sm:$0x3] %vm27_vm2, %v26_v22   ;;  %30 = vst.msk [vmem:[#allocation2 + $0x6] sm:$0xc] %vm27_vm2, %v26_v22  }
  0x88   :  { %v40_v24 = vpop.permute.xlu0 %39   ;;  %v68_v25 = vpop.permute.xlu1 %67  }
  0x89   :  { %42 = vst.msk [vmem:[#allocation2] sm:$0x3] %vm41_vm3, %v40_v24   ;;  %44 = vst.msk [vmem:[#allocation2 + $0x6] sm:$0xc] %vm41_vm3, %v40_v24  }
  0x8a   :  { %56 = vst.msk [vmem:[#allocation2] sm:$0x3] %vm55_vm4, %v54_v23   ;;  %58 = vst.msk [vmem:[#allocation2 + $0x6] sm:$0xc] %vm55_vm4, %v54_v23  }
  0x8b   :  { %70 = vst.msk [vmem:[#allocation2] sm:$0x3] %vm69_vm5, %v68_v25   ;;  %72 = vst.msk [vmem:[#allocation2 + $0x6] sm:$0xc] %vm69_vm5, %v68_v25  }
  0x8c   :  { %v82_v26 = vpop.permute.xlu0 %81   ;;  %v96_v27 = vpop.permute.xlu1 %95  }
  0x8d   :  { %84 = vst.msk [vmem:[#allocation2] sm:$0x3] %vm83_vm6, %v82_v26   ;;  %86 = vst.msk [vmem:[#allocation2 + $0x6] sm:$0xc] %vm83_vm6, %v82_v26  }
  0x8e   :  { %98 = vst.msk [vmem:[#allocation2] sm:$0x3] %vm97_vm7, %v96_v27   ;;  %100 = vst.msk [vmem:[#allocation2 + $0x6] sm:$0xc] %vm97_vm7, %v96_v27  }
  0x90   :  { %v110_v28 = vpop.permute.xlu0 %109  }
  0x91   :  { %112 = vst.msk [vmem:[#allocation2] sm:$0x3] %vm111_vm8, %v110_v28   ;;  %114 = vst.msk [vmem:[#allocation2 + $0x6] sm:$0xc] %vm111_vm8, %v110_v28  }
  0x98   :  { %v119_v29 = vld [vmem:[#allocation2] sm:$0x3]  ;;  %v124_v30 = vld [vmem:[#allocation2 + $0x8] sm:$0x3] }
  0x99   :  { %122 = vst [vmem:[%s198_s1] sm:$0x3] %v119_v29  ;;  %130 = vst [vmem:[%s198_s1 + $0x2] sm:$0x3] %v124_v30 }
  0x9a   :  { %129 = vsyncpa [#allocation1], 1 }

// kernel: dice_loss.1
= control target key start
LH: loop header
LB: loop body
LE: loop exit
PB: predicated region body
PF: predicated region fallthrough
CT: control target
= control target key end

     0   :  { %s766_s12 = smov 0   ;;  %s768_s13 = smov 0   ;;  %s848_s0 = inlined_call_operand.vmem [shape: f32[2,256], index: 0, kind: input, shape index: {}]   ;;  %s849_s1 = inlined_call_operand.vmem [shape: f32[2,256], index: 1, kind: input, shape index: {}]   ;;  %s850_s2 = inlined_call_operand.vmem [shape: f32[2,1,8,1], index: 2, kind: output, shape index: {0}]   ;;  %s851_s3 = inlined_call_operand.vmem [shape: f32[2,1,8,1], index: 3, kind: output, shape index: {1}]  }
   0x1   :  { %s770_s14 = smov 0   ;;  %s772_s15 = smov 0  }
   0x2   :  { %s774_s16 = smov 0  }
   0x3 LB: > { %s23_s17 = sadd.s32 1, %s732_s15  ;;  %p42_p1 = scmp.ne.s32.totalorder %s724_s13, %s720_s12  ;;  %s736_s16 = sphi %s774_s16, %s14_s16   ;;  %s732_s15 = sphi %s772_s15, %s856_s15   ;;  %s728_s14 = sphi %s770_s14, %s855_s14   ;;  %s724_s13 = sphi %s768_s13, %s854_s13   ;;  %s720_s12 = sphi %s766_s12, %s853_s12  }
   0x4   : > { %p24_p0 = scmp.ge.s32.totalorder %s23_s17, 2  ;;  %p43_p2 = scmp.eq.s32.totalorder %s736_s16, 0 }
   0x5   : > { %s35_s20 = sadd.s32 1, %s724_s13  ;;  %p546_p5 = scmp.ge.s32.totalorder %s736_s16, 2 }
   0x6   : > { %s858_s17 = smov (%p24_p0, %s23_s17), 0  ;;  %p797_p3 = por %p43_p2, %p42_p1 }
   0x7   : > { %s31_s19 = ssub.s32 %s732_s15, %s858_s17  ;;  %152 = sbr.rel (%p546_p5) target bundleno = 38 (0x26), region = 16 }
   0x8   : > { %p33_p4 = scmp.eq.s32.totalorder %s31_s19, 0 }
   0xa   : > { %s805_s21 = scalar_select %p33_p4, %s724_s13, %s35_s20  }
   0xc   : > { %155 = sbr.rel (!%p797_p3) target bundleno = 25 (0x19), region = 20  ;;  %s157_s22 = sand.u32 (%p797_p3), 1, %s724_s13  }
   0xd   : > { %s548_s23 = sshll.u32 (%p797_p3), %s732_s15, 1  ;;  %s547_s24 = sshll.u32 (%p797_p3), %s157_s22, 3 }
   0xe   : > { %s167_s27 = scalar_lea.vmem (%p797_p3), %s848_s0, %s548_s23   ;;  %s159_s28 = scalar_lea.vmem (%p797_p3), [#allocation2], %s547_s24  }
   0xf   : > { %s738_s29 = smov (%p797_p3), 0  }
  0x11 LB: >> { %v186_v0 = vld [vmem:[%s167_s27] sm:$0x3]  ;;  %s180_s29 = sadd.s32 1, %s740_s29   ;;  %s740_s29 = sphi %s738_s29, %s180_s29  }
  0x12   : >> { %187 = vst [vmem:[%s159_s28] sm:$0x3] %v186_v0  ;;  %p179_p6 = scmp.ge.s32.totalorder %s180_s29, 1 }
  0x14   : > { %182 = sbr.rel (!%p179_p6) target bundleno = 17 (0x11), region = 151 }
  0x19 PF: > { %220 = sbr.rel (!%p797_p3) target bundleno = 38 (0x26), region = 54  ;;  %s222_s30 = sand.u32 (%p797_p3), 1, %s724_s13  }
  0x1a   : > { %s552_s4 = sshll.u32 (%p797_p3), %s732_s15, 1  ;;  %s551_s5 = sshll.u32 (%p797_p3), %s222_s30, 3 }
  0x1b   : > { %s232_s8 = scalar_lea.vmem (%p797_p3), %s849_s1, %s552_s4   ;;  %s224_s9 = scalar_lea.vmem (%p797_p3), [#allocation3], %s551_s5  }
  0x1c   : > { %s742_s10 = smov (%p797_p3), 0  }
  0x1e LB: >> { %v251_v1 = vld [vmem:[%s232_s8] sm:$0x3]  ;;  %s245_s10 = sadd.s32 1, %s744_s10   ;;  %s744_s10 = sphi %s742_s10, %s245_s10  }
  0x1f   : >> { %252 = vst [vmem:[%s224_s9] sm:$0x3] %v251_v1  ;;  %p244_p7 = scmp.ge.s32.totalorder %s245_s10, 1 }
  0x21   : > { %247 = sbr.rel (!%p244_p7) target bundleno = 30 (0x1e), region = 162 }
  0x26 PF: > { %p555_p8 = scmp.ge.s32.totalorder %s736_s16, 1  ;;  %p284_p9 = scmp.lt.s32.totalorder %s736_s16, 3 }
  0x28   : > { %p285_p10 = pnand %p555_p8, %p284_p9 }
  0x29   : > { %s291_s11 = sand.u32 (!%p285_p10), 1, %s720_s12   ;;  %p340_p11 = scmp.lt.s32.totalorder (!%p285_p10), %s728_s14, 1 }
  0x2a   : > { %288 = sbr.rel (%p285_p10) target bundleno = 193 (0xc1), region = 88  ;;  %s556_s18 = sshll.u32 (!%p285_p10), %s291_s11, 3 }
  0x2b   : > { %s293_s19 = scalar_lea.vmem (!%p285_p10), [#allocation2], %s556_s18  ;;  %s300_s20 = scalar_lea.vmem (!%p285_p10), [#allocation3], %s556_s18 }
  0x2f   : > { %v354_v2 = vld [vmem:[%s293_s19] sm:$0xff]  ;;  %v355_v3 = vld [vmem:[%s300_s20] sm:$0xff]  ;;  %s860_s14 = smov (!%p340_p11, %s728_s14), 1  ;;  %vm364_vm0 = vcmask 7168  }
  0x30   : > { %v356_v4 = vmul.f32 %v355_v3, %v354_v2  ;;  %v357_v5 = vmul.f32 %v354_v2, %v354_v2  ;;  %v358_v6 = vmul.f32 %v355_v3, %v355_v3  ;;  %s558_s22 = sshll.u32 %s860_s14, 3 }
  0x31   : > { %s346_s25 = scalar_lea.vmem %s850_s2, %s558_s22  ;;  %s353_s27 = scalar_lea.vmem %s851_s3, %s558_s22 }
  0x32   : > { %360 = vadd.xlane.f32.xlu0 %v356_v4  ;;  %v359_v7 = vadd.f32 %v358_v6, %v357_v5 }
  0x36   : > { %362 = vadd.xlane.f32.xlu0 %v359_v7 }
  0xbb   : > { %v361_v8 = vpop.xlane.xlu0 %360 }
  0xbc   : > { %365 = vst.msk [vmem:[%s346_s25] sm:$0xff] %vm364_vm0, %v361_v8 }
  0xbf   : > { %v363_v9 = vpop.xlane.xlu0 %362 }
  0xc0   : > { %366 = vst.msk [vmem:[%s353_s27] sm:$0xff] %vm364_vm0, %v363_v9 }
  0xc1 PF: > { %s14_s16 = sadd.s32 1, %s736_s16   ;;  %s853_s12 = smov %s724_s13 }
  0xc2   : > { %p11_p12 = scmp.ge.s32.totalorder %s14_s16, 4   ;;  %s854_s13 = smov %s805_s21 }
  0xc3   : > { %s855_s14 = smov %s732_s15  ;;  %s856_s15 = smov %s858_s17 }
  0xc4   :  { %13 = sbr.rel (!%p11_p12) target bundleno = 3 (0x3), region = 173 }

</bundles_post_ra>
